<compile_context>
chip_gen: v7x
topology: tpu7x:2x2x1
jax: 0.10.0
libtpu: 0.0.40
codegen_flags: <defaults>
</compile_context>

<pallas_src>
import functools

import jax
import jax.numpy as jnp
from jax import lax
from jax.experimental import pallas as pl
from jax.experimental.pallas import tpu as pltpu


def _conv_gemm_kernel(x_ref, w_ref, b_ref, o_ref):
    """out(Cout, tm) = relu(W(Cout, K) @ Xp(K, tm) + b(Cout, 1)); f32 accum."""
    acc = jnp.dot(w_ref[...], x_ref[...], preferred_element_type=jnp.float32)
    acc = acc + b_ref[...]                       # (Cout, tm) + (Cout, 1)
    o_ref[...] = jnp.maximum(acc, 0.0).astype(o_ref.dtype)


def _round_up(x, m):
    return (x + m - 1) // m * m


def _patch_gemm(xp, w_mat, b_col, *, tm):
    """xp: (N, K, Mp) bf16, w_mat: (Cout, K) bf16, b_col: (Cout, 1) f32.

    Returns (N, Cout, Mp) f32 = relu(w_mat @ xp[n] + b_col) per batch.
    """
    N, K, Mp = xp.shape
    Cout = w_mat.shape[0]
    grid_m = Mp // tm

    in_bytes = jnp.dtype(xp.dtype).itemsize
    cost = pl.CostEstimate(
        flops=2 * N * Mp * K * Cout,
        transcendentals=0,
        bytes_accessed=(N * Mp * K * in_bytes + K * Cout * in_bytes
                        + N * Mp * Cout * 4 + Cout * 4),
    )

    return pl.pallas_call(
        _conv_gemm_kernel,
        out_shape=jax.ShapeDtypeStruct((N, Cout, Mp), jnp.float32),
        grid_spec=pltpu.PrefetchScalarGridSpec(
            num_scalar_prefetch=0,
            grid=(N, grid_m),
            in_specs=[
                # Streaming input: lane-dense (K, tm) block, spatial on lanes.
                # (If profiling shows exposed DMA, pipeline_mode=pl.Buffered(3)
                #  on this spec is cheap since K is small.)
                pl.BlockSpec((None, K, tm), lambda n, m: (n, 0, m)),
                # Weight + bias: tiny, resident across the whole grid.
                pl.BlockSpec((Cout, K), lambda n, m: (0, 0)),
                pl.BlockSpec((Cout, 1), lambda n, m: (0, 0)),
            ],
            out_specs=pl.BlockSpec((None, Cout, tm), lambda n, m: (n, 0, m)),
        ),
        compiler_params=pltpu.CompilerParams(
            dimension_semantics=("parallel", "parallel"),
            # Raise v5e's 16 MiB scoped default; safe on v6e (128 MiB) and
            # v7x (64 MiB physical).  Actual use is budgeted in the wrapper.
            vmem_limit_bytes=32 * 1024 * 1024,
        ),
        cost_estimate=cost,
    )(xp, w_mat, b_col)


def downsampling_conv_block(x, weight, bias, *, stride=2):
    """Forward pass of DownsamplingConvBlock (normalization='none').

    x:      (N, Cin, D, H, W)    float32 (NCDHW, same as PyTorch)
    weight: (Cout, Cin, s, s, s) float32 (PyTorch Conv3d layout)
    bias:   (Cout,)              float32
    returns (N, Cout, D//s, H//s, W//s) float32
    """
    s = stride
    N, Cin, D, H, W = x.shape
    Cout = weight.shape[0]
    Do, Ho, Wo = D // s, H // s, W // s
    K = Cin * s * s * s
    Mb = Do * Ho * Wo

    # --- glue: space-to-depth into per-batch (K, Mb) patch matrices ---------
    # bf16 cast first so the one remaining (NCDHW-mandated) rearrangement pass
    # moves half the bytes.
    # TODO(synk): fuse this space-to-depth into the kernel (strided in-VMEM
    # gather of raw NCDHW blocks) to remove the remaining extra HBM pass.
    xb = x[:, :, :Do * s, :Ho * s, :Wo * s].astype(jnp.bfloat16)
    xb = xb.reshape(N, Cin, Do, s, Ho, s, Wo, s)
    xb = xb.transpose(0, 1, 3, 5, 7, 2, 4, 6)   # (N, Cin, kd, kh, kw, Do, Ho, Wo)
    xp = xb.reshape(N, K, Mb)

    # Conv3d weight (Cout, Cin, kd, kh, kw) -> (Cout, K); K-order matches xp.
    w_mat = weight.reshape(Cout, K).astype(jnp.bfloat16)
    b_col = bias.reshape(Cout, 1).astype(jnp.float32)

    # --- tile size: as large as a conservative VMEM budget allows -----------
    # Per lane column of a tile: double-buffered bf16 input + f32 output.
    bytes_per_lane = 2 * K * 2 + 2 * Cout * 4
    vmem_budget = 12 * 1024 * 1024          # conservative across v5e/v6e/v7x
    tm_cap = max(128, (vmem_budget // bytes_per_lane) // 128 * 128)
    tm = min(16384, tm_cap, _round_up(Mb, 128))
    Mp = _round_up(Mb, tm)
    if Mp != Mb:
        xp = jnp.pad(xp, ((0, 0), (0, 0), (0, Mp - Mb)))

    # --- hot path: Pallas lane-dense GEMM + bias + ReLU ----------------------
    out = _patch_gemm(xp, w_mat, b_col, tm=tm)

    # --- back to NCDHW: pure reshape, no transpose ---------------------------
    out = out[:, :, :Mb].reshape(N, Cout, Do, Ho, Wo)
    return out


if __name__ == "__main__":
    key = jax.random.PRNGKey(0)
    k_x, k_w, k_b = jax.random.split(key, 3)

    # Small shapes consistent with the module: N=2, Cin=4, D=H=W=16, Cout=8.
    N, Cin, Cout, D, H, W = 2, 4, 8, 16, 16, 16
    stride = 2

    x = jax.random.normal(k_x, (N, Cin, D, H, W), dtype=jnp.float32)
    fan_in = Cin * stride ** 3
    bound = 1.0 / (fan_in ** 0.5)
    weight = jax.random.uniform(k_w, (Cout, Cin, stride, stride, stride),
                                minval=-bound, maxval=bound, dtype=jnp.float32)
    bias = jax.random.uniform(k_b, (Cout,), minval=-bound, maxval=bound,
                              dtype=jnp.float32)

    fwd = jax.jit(functools.partial(downsampling_conv_block, stride=stride))
    out = fwd(x, weight, bias)
    jax.block_until_ready(out)

    # Reference: same bf16-quantized inputs, f32 conv + bias + ReLU.
    xq = x.astype(jnp.bfloat16).astype(jnp.float32)
    wq = weight.astype(jnp.bfloat16).astype(jnp.float32)
    ref = lax.conv_general_dilated(
        xq, wq, window_strides=(stride,) * 3, padding="VALID",
        dimension_numbers=("NCDHW", "OIDHW", "NCDHW"))
    ref = jnp.maximum(ref + bias.reshape(1, Cout, 1, 1, 1), 0.0)

    assert out.shape == (N, Cout, D // stride, H // stride, W // stride)
    assert jnp.allclose(out, ref, atol=1e-4, rtol=1e-4), (
        float(jnp.max(jnp.abs(out - ref))))

    print("KERNEL_OK")
</pallas_src>

<mosaic_0001>
module attributes {stable_mosaic.version = 11 : i64} {
  func.func @_conv_gemm_kernel(%arg0: i32, %arg1: i32, %arg2: memref<1x32x512xbf16, #tpu.memory_space<vmem>>, %arg3: memref<8x32xbf16, #tpu.memory_space<vmem>>, %arg4: memref<8x1xf32, #tpu.memory_space<vmem>>, %arg5: memref<1x8x512xf32, #tpu.memory_space<vmem>>) attributes {dimension_semantics = [#tpu.dimension_semantics<parallel>, #tpu.dimension_semantics<parallel>], iteration_bounds = array<i64: 2, 1>, scalar_prefetch = 0 : i64, scratch_operands = 0 : i64, tpu.core_type = #tpu.core_type<tc>, window_params = [{transform_indices = @transform_0, window_bounds = array<i64: 1, 32, 512>}, {pipeline_mode = #tpu.pipeline_mode<synchronous>, transform_indices = @transform_1, window_bounds = array<i64: 8, 32>}, {pipeline_mode = #tpu.pipeline_mode<synchronous>, transform_indices = @transform_2, window_bounds = array<i64: 8, 1>}, {transform_indices = @transform_3, window_bounds = array<i64: 1, 8, 512>}]} {
    %c0 = arith.constant 0 : index
    %c0_0 = arith.constant 0 : index
    %0 = vector.load %arg3[%c0, %c0_0] : memref<8x32xbf16, #tpu.memory_space<vmem>>, vector<8x32xbf16>
    %c0_1 = arith.constant 0 : index
    %c0_2 = arith.constant 0 : index
    %c0_3 = arith.constant 0 : index
    %1 = vector.load %arg2[%c0_1, %c0_2, %c0_3] : memref<1x32x512xbf16, #tpu.memory_space<vmem>>, vector<1x32x512xbf16>
    %2 = vector.shape_cast %1 : vector<1x32x512xbf16> to vector<32x512xbf16>
    %cst = arith.constant dense<0.000000e+00> : vector<8x512xf32>
    %3 = tpu.matmul %0, %2, %cst {dimension_numbers = #tpu.dot_dimension_numbers<[1], [0], [0], [1], [0, 0, 1, 1], [], []>} : vector<8x32xbf16>, vector<32x512xbf16>, vector<8x512xf32> -> vector<8x512xf32>
    %c0_4 = arith.constant 0 : index
    %c0_5 = arith.constant 0 : index
    %4 = vector.load %arg4[%c0_4, %c0_5] : memref<8x1xf32, #tpu.memory_space<vmem>>, vector<8x1xf32>
    %5 = vector.broadcast %4 : vector<8x1xf32> to vector<8x512xf32>
    %6 = arith.addf %3, %5 : vector<8x512xf32>
    %cst_6 = arith.constant 0.000000e+00 : f32
    %7 = vector.broadcast %cst_6 : f32 to vector<8x512xf32>
    %8 = arith.maximumf %6, %7 : vector<8x512xf32>
    %c0_7 = arith.constant 0 : index
    %c0_8 = arith.constant 0 : index
    %c0_9 = arith.constant 0 : index
    %9 = vector.load %arg5[%c0_7, %c0_8, %c0_9] : memref<1x8x512xf32, #tpu.memory_space<vmem>>, vector<1x8x512xf32>
    %10 = vector.shape_cast %9 : vector<1x8x512xf32> to vector<8x512xf32>
    %11 = vector.shape_cast %8 : vector<8x512xf32> to vector<1x8x512xf32>
    tpu.vector_store %arg5[%c0_7, %c0_8, %c0_9], %11 {strides = array<i32>} : memref<1x8x512xf32, #tpu.memory_space<vmem>>, vector<1x8x512xf32>,
    return
  }
  func.func @transform_0(%arg0: i32, %arg1: i32) -> (i32, i32, i32) {
    %c0_i32 = arith.constant 0 : i32
    %c0_i32_0 = arith.constant 0 : i32
    return %arg0, %c0_i32, %arg1 : i32, i32, i32
  }
  func.func @transform_1(%arg0: i32, %arg1: i32) -> (i32, i32) {
    %c0_i32 = arith.constant 0 : i32
    %c0_i32_0 = arith.constant 0 : i32
    %c0_i32_1 = arith.constant 0 : i32
    return %c0_i32, %c0_i32_0 : i32, i32
  }
  func.func @transform_2(%arg0: i32, %arg1: i32) -> (i32, i32) {
    %c0_i32 = arith.constant 0 : i32
    %c0_i32_0 = arith.constant 0 : i32
    %c0_i32_1 = arith.constant 0 : i32
    return %c0_i32, %c0_i32_0 : i32, i32
  }
  func.func @transform_3(%arg0: i32, %arg1: i32) -> (i32, i32, i32) {
    %c0_i32 = arith.constant 0 : i32
    %c0_i32_0 = arith.constant 0 : i32
    return %arg0, %c0_i32, %arg1 : i32, i32, i32
  }
}

</mosaic_0001>

<bundles_post_ra>
// kernel: downsampling_conv_block.1
= control target key start
LH: loop header
LB: loop body
LE: loop exit
PB: predicated region body
PF: predicated region fallthrough
CT: control target
= control target key end

     0   :  { %s553_s12 = smov 0   ;;  %s555_s13 = smov 0   ;;  %s596_s0 = inlined_call_operand.vmem [shape: bf16[2,32,512], index: 0, kind: input, shape index: {}]   ;;  %s597_s1 = inlined_call_operand.vmem [shape: bf16[8,32], index: 1, kind: input, shape index: {}]   ;;  %s598_s2 = inlined_call_operand.vmem [shape: f32[8,1], index: 2, kind: input, shape index: {}]   ;;  %s599_s3 = inlined_call_operand.vmem [shape: f32[2,8,512], index: 3, kind: output, shape index: {}]  }
   0x1   :  { %s557_s14 = smov 0  }
   0x2 LB: > { %s25_s15 = sadd.s32 1, %s526_s13  ;;  %p451_p0 = scmp.ge.s32.totalorder %s530_s14, 1  ;;  %s530_s14 = sphi %s557_s14, %s13_s14   ;;  %s526_s13 = sphi %s555_s13, %s601_s13   ;;  %s522_s12 = sphi %s553_s12, %s600_s12  }
   0x3   : > { %p27_p1 = scmp.ge.s32.totalorder %s25_s15, 2  ;;  %p158_p2 = scmp.lt.s32.totalorder %s530_s14, 3 }
   0x5   : > { %s603_s15 = smov (%p27_p1, %s25_s15), 0  ;;  %p159_p3 = pnand %p451_p0, %p158_p2 }
   0x6   : > { %p191_p4 = scmp.lt.s32.totalorder (!%p159_p3), %s522_s12, 1  ;;  %v220_v0 = vld [vmem:[%s598_s2] sm:$0xff] (!%p159_p3)  ;;  %v532_v1 = vmov (!%p159_p3), 0   ;;  %vm266_vm0 = vcmask (!%p159_p3), 261120  }
   0x7   : > { %162 = sbr.rel (%p159_p3) target bundleno = 244 (0xf4), region = 32  ;;  %302 = vmatprep.mubr.bf16.mxu0 (!%p159_p3), %v532_v1  ;;  %343 = vmatprep.mubr.bf16.mxu1 (!%p159_p3), %v532_v1  ;;  %v211_v10 = vld [vmem:[%s597_s1] sm:$0xf] (!%p159_p3) }
   0x8   : > { %495 = vset.pattern.permute.xlu0 (!%p159_p3), %v532_v1 }
   0x9   : > { %223 = vperm.xlu0 (!%p159_p3), %495, %v220_v0  }
   0xe   : > { %s605_s12 = smov (!%p191_p4, %s522_s12), 1 }
   0xf   : > { %s468_s18 = sshll.u32 %s605_s12, 6  ;;  %s469_s24 = sshll.u32 %s605_s12, 5 }
  0x10   : > { %s198_s21 = scalar_lea.vmem %s596_s0, %s468_s18  ;;  %s208_s27 = scalar_lea.vmem %s599_s3, %s469_s24 }
  0x11   : > { %v496_v2 = vld [vmem:[%s198_s21 + $0x4] ss:$16 sps:$4 sm:$0xff]   ;;  %v498_v3 = vld [vmem:[%s198_s21 + $0xc] ss:$16 sps:$4 sm:$0xff]   ;;  %v500_v4 = vld [vmem:[%s198_s21] ss:$16 sps:$4 sm:$0xff]  }
  0x12   : > { %270 = vmatprep.subr.bf16.mxu0 %v496_v2  ;;  %v501_v5 = vld [vmem:[%s198_s21 + $0x8] ss:$16 sps:$4 sm:$0xff]   ;;  %311 = vmatprep.subr.bf16.mxu1 %v498_v3  ;;  %v502_v6 = vld [vmem:[%s198_s21 + $0x24] ss:$16 sps:$4 sm:$0xff]   ;;  %v504_v7 = vld [vmem:[%s198_s21 + $0x2c] ss:$16 sps:$4 sm:$0xff]  }
  0x13   : > { %271 = vmatpush1.bf16.msra.mxu0 %v500_v4  ;;  %312 = vmatpush1.bf16.msra.mxu1 %v501_v5  ;;  %v506_v8 = vld [vmem:[%s198_s21 + $0x20] ss:$16 sps:$4 sm:$0xff]   ;;  %v507_v9 = vld [vmem:[%s198_s21 + $0x28] ss:$16 sps:$4 sm:$0xff]  }
  0x14   : > { %272 = vmatprep.subr.bf16.mxu0 %v502_v6  ;;  %313 = vmatprep.subr.bf16.mxu1 %v504_v7 }
  0x17   : > { %273 = vmatpush1.bf16.msra.mxu0 %v506_v8  ;;  %314 = vmatpush1.bf16.msra.mxu1 %v507_v9 }
  0x1a   : > { %464 = vmatmul.mubr.msk.bf16.vlgmr.msra.gmra.mrb[0].mxu0 %vm266_vm0, %v211_v10  ;;  %465 = vmatmul.mubr.msk.bf16.vlgmr.msra.gmra.mrb[0].mxu1 %vm266_vm0, %v211_v10 }
  0x88   : > { %v224_v11 = vpop.permute.xlu0 %223 }
  0xed   : > { %v304_v12 = vpop.f32.mrb[0].mxu0  ;;  %v345_v13 = vpop.f32.mrb[0].mxu1 }
  0xee   : > { %v305_v14 = vadd.f32 %v304_v12, %v224_v11  ;;  %v346_v15 = vadd.f32 %v345_v13, %v224_v11  ;;  %v306_v16 = vpop.f32.mrb[1].mxu0  ;;  %v347_v17 = vpop.f32.mrb[1].mxu1 }
  0xef   : > { %v307_v18 = vadd.f32 %v306_v16, %v224_v11  ;;  %v348_v19 = vadd.f32 %v347_v17, %v224_v11  ;;  %v308_v20 = vpop.f32.mrb[2].mxu0  ;;  %v349_v21 = vpop.f32.mrb[2].mxu1 }
  0xf0   : > { %v352_v22 = vmax.f32 %v305_v14, 0.0  ;;  %v354_v23 = vmax.f32 %v346_v15, 0.0  ;;  %v309_v24 = vpop.f32.mrb[3].mxu0  ;;  %v350_v25 = vpop.f32.mrb[3].mxu1 }
  0xf1   : > { %v353_v26 = vmax.f32 %v307_v18, 0.0  ;;  %v355_v27 = vmax.f32 %v348_v19, 0.0 }
  0xf2   : > { %356 = vst [vmem:[%s208_s27] sm:$0xff] %v352_v22  ;;  %358 = vst [vmem:[%s208_s27 + $0x10] sm:$0xff] %v354_v23 }
  0xf3   : > { %357 = vst [vmem:[%s208_s27 + $0x8] sm:$0xff] %v353_v26  ;;  %359 = vst [vmem:[%s208_s27 + $0x18] sm:$0xff] %v355_v27 }
  0xf4 PF: > { %s13_s14 = sadd.s32 1, %s530_s14   ;;  %s600_s12 = smov %s526_s13 }
  0xf5   : > { %p10_p5 = scmp.ge.s32.totalorder %s13_s14, 4   ;;  %s601_s13 = smov %s603_s15 }
  0xf7   :  { %12 = sbr.rel (!%p10_p5) target bundleno = 2 (0x2), region = 62 }

</bundles_post_ra>
